<compile_context>
chip_gen: v7x
topology: tpu7x:2x2x1
jax: 0.10.0
libtpu: 0.0.40
codegen_flags: <defaults>
</compile_context>

<pallas_src>
import jax
import jax.numpy as jnp
from jax.experimental import pallas as pl
from jax.experimental.pallas import tpu as pltpu

LANE = 128
SUBLANE = 8


def rnn_fc_kernel(emb_ref, len_ref,
                  wih0_ref, whh0_ref, b0_ref,
                  w1_ref, b1_ref,
                  wfc_ref, bfc_ref,
                  out_ref):
    """Fused 2-layer vanilla-RNN recurrence + final Linear for one batch block."""
    T, BB, E = emb_ref.shape
    H = whh0_ref.shape[0]

    # ---- hoisted loads: weights/biases live in vregs across the unrolled loop
    whh0 = whh0_ref[...]                            # [H, H]
    w1 = w1_ref[...]                                # [2H, H] (= [Wih1 ; Whh1])
    b1 = b1_ref[...]                                # [1, H]  (= bih1 + bhh1)
    lengths = len_ref[...]                          # [BB, 1] int32

    # ---- layer-0 input projection for ALL timesteps as one big MXU matmul
    emb = emb_ref[...].reshape(T * BB, E)           # [T*BB, E]
    proj0 = (jnp.dot(emb, wih0_ref[...], preferred_element_type=jnp.float32)
             + b0_ref[...])                         # [T*BB, H], bias pre-folded
    proj0 = proj0.reshape(T, BB, H)

    h0 = jnp.zeros((BB, H), jnp.float32)
    h1 = jnp.zeros((BB, H), jnp.float32)

    # ---- fused 2-layer recurrence, fully unrolled (T is static and small)
    for t in range(T):
        mask_t = lengths > t                        # [BB, 1] packed-seq mask
        # layer 0: only the recurrent matmul remains on the critical path
        h0_new = jnp.tanh(
            proj0[t]
            + jnp.dot(h0, whh0, preferred_element_type=jnp.float32))
        h0 = jnp.where(mask_t, h0_new, h0)          # freeze past seq end
        # layer 1: input + recurrent matmuls fused into a single MXU push,
        # consuming the *masked* h0 (matches packed-sequence semantics)
        h1_new = jnp.tanh(
            jnp.dot(jnp.concatenate([h0, h1], axis=-1), w1,
                    preferred_element_type=jnp.float32)
            + b1)
        h1 = jnp.where(mask_t, h1_new, h1)

    # ---- fc (Linear) on last-layer final hidden, lane-padded 128-wide output
    out_ref[...] = (jnp.dot(h1, wfc_ref[...], preferred_element_type=jnp.float32)
                    + bfc_ref[...])


def rnn_forward(text, text_lengths, params, *, batch_block=None):
    """Full module forward. Embedding lookup (gather) is plain-JAX glue; the
    recurrence + fc run inside a single Pallas kernel."""
    emb_table = params["embedding"]                 # [V, E]
    T, B = text.shape
    E = emb_table.shape[1]
    H = params["whh0"].shape[0]
    O = params["wfc"].shape[1]
    O_pad = ((O + LANE - 1) // LANE) * LANE         # lane-dense output slab

    # Embedding lookup + dropout (eval -> identity). padding_idx row is zero.
    embedded = jnp.take(emb_table, text, axis=0).astype(jnp.float32)   # [T, B, E]
    lengths2d = text_lengths.astype(jnp.int32).reshape(B, 1)

    # Pre-fold the two RNN biases; concat layer-1 weights; lane-pad fc weights.
    b0 = (params["bih0"] + params["bhh0"]).reshape(1, H)
    b1 = (params["bih1"] + params["bhh1"]).reshape(1, H)
    w1 = jnp.concatenate([params["wih1"], params["whh1"]], axis=0)     # [2H, H]
    wfc_pad = jnp.zeros((H, O_pad), jnp.float32).at[:, :O].set(params["wfc"])
    bfc_pad = jnp.zeros((1, O_pad), jnp.float32).at[:, :O].set(
        params["bfc"].reshape(1, O))

    # Batch split: only when each block stays large enough to amortise the
    # per-grid-step overhead (the recurrence is latency-bound at small B, and
    # a 1-TC chip would just run the blocks serially). Large batches shard
    # across the v7x megacore via the ("parallel",) grid axis.
    if batch_block is None:
        if B % (2 * SUBLANE) == 0 and (B // 2) >= 128:
            batch_block = B // 2
        else:
            batch_block = B
    assert B % batch_block == 0
    n_blocks = B // batch_block

    def full(shape):
        return pl.BlockSpec(shape, lambda i, _n=len(shape): (0,) * _n)

    grid_spec = pltpu.PrefetchScalarGridSpec(
        num_scalar_prefetch=0,
        grid=(n_blocks,),
        in_specs=[
            pl.BlockSpec((T, batch_block, E), lambda i: (0, i, 0)),   # embedded
            pl.BlockSpec((batch_block, 1), lambda i: (i, 0)),         # lengths
            full((E, H)), full((H, H)), full((1, H)),                 # layer 0
            full((2 * H, H)), full((1, H)),                           # layer 1
            full((H, O_pad)), full((1, O_pad)),                       # fc
        ],
        out_specs=pl.BlockSpec((batch_block, O_pad), lambda i: (i, 0)),
    )

    out_pad = pl.pallas_call(
        rnn_fc_kernel,
        out_shape=jax.ShapeDtypeStruct((B, O_pad), jnp.float32),
        grid_spec=grid_spec,
        compiler_params=pltpu.CompilerParams(
            dimension_semantics=("parallel",)),
    )(embedded, lengths2d,
      params["wih0"], params["whh0"], b0,
      w1, b1,
      wfc_pad, bfc_pad)

    return out_pad[:, :O]


def ref_forward(text, text_lengths, params):
    """Pure-JAX reference matching PyTorch semantics (eval mode)."""
    emb = jnp.take(params["embedding"], text, axis=0)                  # [T, B, E]
    T, B = text.shape
    H = params["whh0"].shape[0]
    x = emb
    h = None
    for (wih, whh, bih, bhh) in [
        (params["wih0"], params["whh0"], params["bih0"], params["bhh0"]),
        (params["wih1"], params["whh1"], params["bih1"], params["bhh1"]),
    ]:
        h = jnp.zeros((B, H), jnp.float32)
        outs = []
        for t in range(T):
            h_new = jnp.tanh(x[t] @ wih + bih + h @ whh + bhh)
            h = jnp.where((text_lengths > t)[:, None], h_new, h)
            outs.append(h)
        x = jnp.stack(outs)
    return h @ params["wfc"] + params["bfc"]


if __name__ == "__main__":
    # Module hyperparameters (small, consistent with the forward pass):
    INPUT_DIM = 50        # vocab size
    EMBEDDING_DIM = 32
    HIDDEN_DIM = 32
    OUTPUT_DIM = 1
    N_LAYERS = 2
    N_DIRECTIONS = 1
    PAD_IDX = 0
    T, B = 8, 16          # seq_len, batch

    key = jax.random.PRNGKey(0)
    keys = jax.random.split(key, 13)
    scale = 1.0 / jnp.sqrt(jnp.float32(HIDDEN_DIM))

    def unif(k, shape):
        return jax.random.uniform(k, shape, jnp.float32, -scale, scale)

    emb_table = jax.random.normal(keys[0], (INPUT_DIM, EMBEDDING_DIM), jnp.float32)
    emb_table = emb_table.at[PAD_IDX].set(0.0)     # padding_idx behavior

    # Weights stored pre-transposed for [B, in] @ [in, H] kernel matmuls.
    params = {
        "embedding": emb_table,
        "wih0": unif(keys[1], (EMBEDDING_DIM, HIDDEN_DIM)),
        "whh0": unif(keys[2], (HIDDEN_DIM, HIDDEN_DIM)),
        "bih0": unif(keys[3], (1, HIDDEN_DIM)),
        "bhh0": unif(keys[4], (1, HIDDEN_DIM)),
        "wih1": unif(keys[5], (HIDDEN_DIM, HIDDEN_DIM)),
        "whh1": unif(keys[6], (HIDDEN_DIM, HIDDEN_DIM)),
        "bih1": unif(keys[7], (1, HIDDEN_DIM)),
        "bhh1": unif(keys[8], (1, HIDDEN_DIM)),
        "wfc": unif(keys[9], (HIDDEN_DIM * N_DIRECTIONS, OUTPUT_DIM)),
        "bfc": unif(keys[10], (1, OUTPUT_DIM)),
    }

    # Lengths sorted descending (pack_padded_sequence enforce_sorted=True).
    text_lengths = jnp.array([8, 8, 7, 7, 6, 6, 5, 5, 4, 4, 3, 3, 2, 2, 1, 1],
                             dtype=jnp.int32)
    text = jax.random.randint(keys[11], (T, B), 1, INPUT_DIM, dtype=jnp.int32)
    t_idx = jnp.arange(T, dtype=jnp.int32)[:, None]
    text = jnp.where(t_idx < text_lengths[None, :], text, PAD_IDX)

    out = rnn_forward(text, text_lengths, params)
    out = jax.block_until_ready(out)

    ref = ref_forward(text, text_lengths, params)
    assert out.shape == (B, OUTPUT_DIM)
    assert jnp.allclose(out, ref, atol=1e-2, rtol=1e-2), (out, ref)

    print("KERNEL_OK")
</pallas_src>

<mosaic_0001>
module attributes {stable_mosaic.version = 11 : i64} {
  func.func @rnn_fc_kernel(%arg0: i32, %arg1: memref<8x16x32xf32, #tpu.memory_space<vmem>>, %arg2: memref<16x1xi32, #tpu.memory_space<vmem>>, %arg3: memref<32x32xf32, #tpu.memory_space<vmem>>, %arg4: memref<32x32xf32, #tpu.memory_space<vmem>>, %arg5: memref<1x32xf32, #tpu.memory_space<vmem>>, %arg6: memref<64x32xf32, #tpu.memory_space<vmem>>, %arg7: memref<1x32xf32, #tpu.memory_space<vmem>>, %arg8: memref<32x128xf32, #tpu.memory_space<vmem>>, %arg9: memref<1x128xf32, #tpu.memory_space<vmem>>, %arg10: memref<16x128xf32, #tpu.memory_space<vmem>>) attributes {dimension_semantics = [#tpu.dimension_semantics<parallel>], iteration_bounds = array<i64: 1>, scalar_prefetch = 0 : i64, scratch_operands = 0 : i64, tpu.core_type = #tpu.core_type<tc>, window_params = [{transform_indices = @transform_0, window_bounds = array<i64: 8, 16, 32>}, {transform_indices = @transform_1, window_bounds = array<i64: 16, 1>}, {pipeline_mode = #tpu.pipeline_mode<synchronous>, transform_indices = @transform_2, window_bounds = array<i64: 32, 32>}, {pipeline_mode = #tpu.pipeline_mode<synchronous>, transform_indices = @transform_3, window_bounds = array<i64: 32, 32>}, {pipeline_mode = #tpu.pipeline_mode<synchronous>, transform_indices = @transform_4, window_bounds = array<i64: 1, 32>}, {pipeline_mode = #tpu.pipeline_mode<synchronous>, transform_indices = @transform_5, window_bounds = array<i64: 64, 32>}, {pipeline_mode = #tpu.pipeline_mode<synchronous>, transform_indices = @transform_6, window_bounds = array<i64: 1, 32>}, {pipeline_mode = #tpu.pipeline_mode<synchronous>, transform_indices = @transform_7, window_bounds = array<i64: 32, 128>}, {pipeline_mode = #tpu.pipeline_mode<synchronous>, transform_indices = @transform_8, window_bounds = array<i64: 1, 128>}, {transform_indices = @transform_9, window_bounds = array<i64: 16, 128>}]} {
    %c0 = arith.constant 0 : index
    %c0_0 = arith.constant 0 : index
    %0 = vector.load %arg4[%c0, %c0_0] : memref<32x32xf32, #tpu.memory_space<vmem>>, vector<32x32xf32>
    %c0_1 = arith.constant 0 : index
    %c0_2 = arith.constant 0 : index
    %1 = vector.load %arg6[%c0_1, %c0_2] : memref<64x32xf32, #tpu.memory_space<vmem>>, vector<64x32xf32>
    %c0_3 = arith.constant 0 : index
    %c0_4 = arith.constant 0 : index
    %2 = vector.load %arg7[%c0_3, %c0_4] : memref<1x32xf32, #tpu.memory_space<vmem>>, vector<1x32xf32>
    %c0_5 = arith.constant 0 : index
    %c0_6 = arith.constant 0 : index
    %3 = vector.load %arg2[%c0_5, %c0_6] : memref<16x1xi32, #tpu.memory_space<vmem>>, vector<16x1xi32>
    %c0_7 = arith.constant 0 : index
    %c0_8 = arith.constant 0 : index
    %c0_9 = arith.constant 0 : index
    %4 = vector.load %arg1[%c0_7, %c0_8, %c0_9] : memref<8x16x32xf32, #tpu.memory_space<vmem>>, vector<8x16x32xf32>
    %5 = vector.shape_cast %4 : vector<8x16x32xf32> to vector<128x32xf32>
    %c0_10 = arith.constant 0 : index
    %c0_11 = arith.constant 0 : index
    %6 = vector.load %arg3[%c0_10, %c0_11] : memref<32x32xf32, #tpu.memory_space<vmem>>, vector<32x32xf32>
    %cst = arith.constant dense<0.000000e+00> : vector<128x32xf32>
    %7 = tpu.matmul %5, %6, %cst {dimension_numbers = #tpu.dot_dimension_numbers<[1], [0], [0], [1], [0, 0, 1, 1], [], []>} : vector<128x32xf32>, vector<32x32xf32>, vector<128x32xf32> -> vector<128x32xf32>
    %c0_12 = arith.constant 0 : index
    %c0_13 = arith.constant 0 : index
    %8 = vector.load %arg5[%c0_12, %c0_13] : memref<1x32xf32, #tpu.memory_space<vmem>>, vector<1x32xf32>
    %9 = vector.broadcast %8 : vector<1x32xf32> to vector<128x32xf32>
    %10 = arith.addf %7, %9 : vector<128x32xf32>
    %11 = vector.shape_cast %10 : vector<128x32xf32> to vector<8x16x32xf32>
    %cst_14 = arith.constant 0.000000e+00 : f32
    %12 = vector.broadcast %cst_14 : f32 to vector<16x32xf32>
    %cst_15 = arith.constant 0.000000e+00 : f32
    %13 = vector.broadcast %cst_15 : f32 to vector<16x32xf32>
    %c0_i32 = arith.constant 0 : i32
    %14 = vector.broadcast %c0_i32 : i32 to vector<16x1xi32>
    %15 = arith.cmpi sgt, %3, %14 : vector<16x1xi32>
    %16 = vector.extract_strided_slice %11 {offsets = [0, 0, 0], sizes = [1, 16, 32], strides = [1, 1, 1]} : vector<8x16x32xf32> to vector<1x16x32xf32>
    %17 = vector.shape_cast %16 : vector<1x16x32xf32> to vector<16x32xf32>
    %cst_16 = arith.constant dense<0.000000e+00> : vector<16x32xf32>
    %18 = tpu.matmul %12, %0, %cst_16 {dimension_numbers = #tpu.dot_dimension_numbers<[1], [0], [0], [1], [0, 0, 1, 1], [], []>} : vector<16x32xf32>, vector<32x32xf32>, vector<16x32xf32> -> vector<16x32xf32>
    %19 = arith.addf %17, %18 : vector<16x32xf32>
    %20 = math.tanh %19 : vector<16x32xf32>
    %21 = vector.shape_cast %15 : vector<16x1xi1> to vector<16x1xi1>
    %22 = vector.broadcast %21 : vector<16x1xi1> to vector<16x32xi1>
    %23 = arith.select %22, %20, %12 : vector<16x32xi1>, vector<16x32xf32>
    %24 = tpu.concatenate %23, %13 in 1 : vector<16x32xf32>, vector<16x32xf32> -> vector<16x64xf32>
    %cst_17 = arith.constant dense<0.000000e+00> : vector<16x32xf32>
    %25 = tpu.matmul %24, %1, %cst_17 {dimension_numbers = #tpu.dot_dimension_numbers<[1], [0], [0], [1], [0, 0, 1, 1], [], []>} : vector<16x64xf32>, vector<64x32xf32>, vector<16x32xf32> -> vector<16x32xf32>
    %26 = vector.broadcast %2 : vector<1x32xf32> to vector<16x32xf32>
    %27 = arith.addf %25, %26 : vector<16x32xf32>
    %28 = math.tanh %27 : vector<16x32xf32>
    %29 = vector.shape_cast %15 : vector<16x1xi1> to vector<16x1xi1>
    %30 = vector.broadcast %29 : vector<16x1xi1> to vector<16x32xi1>
    %31 = arith.select %30, %28, %13 : vector<16x32xi1>, vector<16x32xf32>
    %c1_i32 = arith.constant 1 : i32
    %32 = vector.broadcast %c1_i32 : i32 to vector<16x1xi32>
    %33 = arith.cmpi sgt, %3, %32 : vector<16x1xi32>
    %34 = vector.extract_strided_slice %11 {offsets = [1, 0, 0], sizes = [1, 16, 32], strides = [1, 1, 1]} : vector<8x16x32xf32> to vector<1x16x32xf32>
    %35 = vector.shape_cast %34 : vector<1x16x32xf32> to vector<16x32xf32>
    %cst_18 = arith.constant dense<0.000000e+00> : vector<16x32xf32>
    %36 = tpu.matmul %23, %0, %cst_18 {dimension_numbers = #tpu.dot_dimension_numbers<[1], [0], [0], [1], [0, 0, 1, 1], [], []>} : vector<16x32xf32>, vector<32x32xf32>, vector<16x32xf32> -> vector<16x32xf32>
    %37 = arith.addf %35, %36 : vector<16x32xf32>
    %38 = math.tanh %37 : vector<16x32xf32>
    %39 = vector.shape_cast %33 : vector<16x1xi1> to vector<16x1xi1>
    %40 = vector.broadcast %39 : vector<16x1xi1> to vector<16x32xi1>
    %41 = arith.select %40, %38, %23 : vector<16x32xi1>, vector<16x32xf32>
    %42 = tpu.concatenate %41, %31 in 1 : vector<16x32xf32>, vector<16x32xf32> -> vector<16x64xf32>
    %cst_19 = arith.constant dense<0.000000e+00> : vector<16x32xf32>
    %43 = tpu.matmul %42, %1, %cst_19 {dimension_numbers = #tpu.dot_dimension_numbers<[1], [0], [0], [1], [0, 0, 1, 1], [], []>} : vector<16x64xf32>, vector<64x32xf32>, vector<16x32xf32> -> vector<16x32xf32>
    %44 = vector.broadcast %2 : vector<1x32xf32> to vector<16x32xf32>
    %45 = arith.addf %43, %44 : vector<16x32xf32>
    %46 = math.tanh %45 : vector<16x32xf32>
    %47 = vector.shape_cast %33 : vector<16x1xi1> to vector<16x1xi1>
    %48 = vector.broadcast %47 : vector<16x1xi1> to vector<16x32xi1>
    %49 = arith.select %48, %46, %31 : vector<16x32xi1>, vector<16x32xf32>
    %c2_i32 = arith.constant 2 : i32
    %50 = vector.broadcast %c2_i32 : i32 to vector<16x1xi32>
    %51 = arith.cmpi sgt, %3, %50 : vector<16x1xi32>
    %52 = vector.extract_strided_slice %11 {offsets = [2, 0, 0], sizes = [1, 16, 32], strides = [1, 1, 1]} : vector<8x16x32xf32> to vector<1x16x32xf32>
    %53 = vector.shape_cast %52 : vector<1x16x32xf32> to vector<16x32xf32>
    %cst_20 = arith.constant dense<0.000000e+00> : vector<16x32xf32>
    %54 = tpu.matmul %41, %0, %cst_20 {dimension_numbers = #tpu.dot_dimension_numbers<[1], [0], [0], [1], [0, 0, 1, 1], [], []>} : vector<16x32xf32>, vector<32x32xf32>, vector<16x32xf32> -> vector<16x32xf32>
    %55 = arith.addf %53, %54 : vector<16x32xf32>
    %56 = math.tanh %55 : vector<16x32xf32>
    %57 = vector.shape_cast %51 : vector<16x1xi1> to vector<16x1xi1>
    %58 = vector.broadcast %57 : vector<16x1xi1> to vector<16x32xi1>
    %59 = arith.select %58, %56, %41 : vector<16x32xi1>, vector<16x32xf32>
    %60 = tpu.concatenate %59, %49 in 1 : vector<16x32xf32>, vector<16x32xf32> -> vector<16x64xf32>
    %cst_21 = arith.constant dense<0.000000e+00> : vector<16x32xf32>
    %61 = tpu.matmul %60, %1, %cst_21 {dimension_numbers = #tpu.dot_dimension_numbers<[1], [0], [0], [1], [0, 0, 1, 1], [], []>} : vector<16x64xf32>, vector<64x32xf32>, vector<16x32xf32> -> vector<16x32xf32>
    %62 = vector.broadcast %2 : vector<1x32xf32> to vector<16x32xf32>
    %63 = arith.addf %61, %62 : vector<16x32xf32>
    %64 = math.tanh %63 : vector<16x32xf32>
    %65 = vector.shape_cast %51 : vector<16x1xi1> to vector<16x1xi1>
    %66 = vector.broadcast %65 : vector<16x1xi1> to vector<16x32xi1>
    %67 = arith.select %66, %64, %49 : vector<16x32xi1>, vector<16x32xf32>
    %c3_i32 = arith.constant 3 : i32
    %68 = vector.broadcast %c3_i32 : i32 to vector<16x1xi32>
    %69 = arith.cmpi sgt, %3, %68 : vector<16x1xi32>
    %70 = vector.extract_strided_slice %11 {offsets = [3, 0, 0], sizes = [1, 16, 32], strides = [1, 1, 1]} : vector<8x16x32xf32> to vector<1x16x32xf32>
    %71 = vector.shape_cast %70 : vector<1x16x32xf32> to vector<16x32xf32>
    %cst_22 = arith.constant dense<0.000000e+00> : vector<16x32xf32>
    %72 = tpu.matmul %59, %0, %cst_22 {dimension_numbers = #tpu.dot_dimension_numbers<[1], [0], [0], [1], [0, 0, 1, 1], [], []>} : vector<16x32xf32>, vector<32x32xf32>, vector<16x32xf32> -> vector<16x32xf32>
    %73 = arith.addf %71, %72 : vector<16x32xf32>
    %74 = math.tanh %73 : vector<16x32xf32>
    %75 = vector.shape_cast %69 : vector<16x1xi1> to vector<16x1xi1>
    %76 = vector.broadcast %75 : vector<16x1xi1> to vector<16x32xi1>
    %77 = arith.select %76, %74, %59 : vector<16x32xi1>, vector<16x32xf32>
    %78 = tpu.concatenate %77, %67 in 1 : vector<16x32xf32>, vector<16x32xf32> -> vector<16x64xf32>
    %cst_23 = arith.constant dense<0.000000e+00> : vector<16x32xf32>
    %79 = tpu.matmul %78, %1, %cst_23 {dimension_numbers = #tpu.dot_dimension_numbers<[1], [0], [0], [1], [0, 0, 1, 1], [], []>} : vector<16x64xf32>, vector<64x32xf32>, vector<16x32xf32> -> vector<16x32xf32>
    %80 = vector.broadcast %2 : vector<1x32xf32> to vector<16x32xf32>
    %81 = arith.addf %79, %80 : vector<16x32xf32>
    %82 = math.tanh %81 : vector<16x32xf32>
    %83 = vector.shape_cast %69 : vector<16x1xi1> to vector<16x1xi1>
    %84 = vector.broadcast %83 : vector<16x1xi1> to vector<16x32xi1>
    %85 = arith.select %84, %82, %67 : vector<16x32xi1>, vector<16x32xf32>
    %c4_i32 = arith.constant 4 : i32
    %86 = vector.broadcast %c4_i32 : i32 to vector<16x1xi32>
    %87 = arith.cmpi sgt, %3, %86 : vector<16x1xi32>
    %88 = vector.extract_strided_slice %11 {offsets = [4, 0, 0], sizes = [1, 16, 32], strides = [1, 1, 1]} : vector<8x16x32xf32> to vector<1x16x32xf32>
    %89 = vector.shape_cast %88 : vector<1x16x32xf32> to vector<16x32xf32>
    %cst_24 = arith.constant dense<0.000000e+00> : vector<16x32xf32>
    %90 = tpu.matmul %77, %0, %cst_24 {dimension_numbers = #tpu.dot_dimension_numbers<[1], [0], [0], [1], [0, 0, 1, 1], [], []>} : vector<16x32xf32>, vector<32x32xf32>, vector<16x32xf32> -> vector<16x32xf32>
    %91 = arith.addf %89, %90 : vector<16x32xf32>
    %92 = math.tanh %91 : vector<16x32xf32>
    %93 = vector.shape_cast %87 : vector<16x1xi1> to vector<16x1xi1>
    %94 = vector.broadcast %93 : vector<16x1xi1> to vector<16x32xi1>
    %95 = arith.select %94, %92, %77 : vector<16x32xi1>, vector<16x32xf32>
    %96 = tpu.concatenate %95, %85 in 1 : vector<16x32xf32>, vector<16x32xf32> -> vector<16x64xf32>
    %cst_25 = arith.constant dense<0.000000e+00> : vector<16x32xf32>
    %97 = tpu.matmul %96, %1, %cst_25 {dimension_numbers = #tpu.dot_dimension_numbers<[1], [0], [0], [1], [0, 0, 1, 1], [], []>} : vector<16x64xf32>, vector<64x32xf32>, vector<16x32xf32> -> vector<16x32xf32>
    %98 = vector.broadcast %2 : vector<1x32xf32> to vector<16x32xf32>
    %99 = arith.addf %97, %98 : vector<16x32xf32>
    %100 = math.tanh %99 : vector<16x32xf32>
    %101 = vector.shape_cast %87 : vector<16x1xi1> to vector<16x1xi1>
    %102 = vector.broadcast %101 : vector<16x1xi1> to vector<16x32xi1>
    %103 = arith.select %102, %100, %85 : vector<16x32xi1>, vector<16x32xf32>
    %c5_i32 = arith.constant 5 : i32
    %104 = vector.broadcast %c5_i32 : i32 to vector<16x1xi32>
    %105 = arith.cmpi sgt, %3, %104 : vector<16x1xi32>
    %106 = vector.extract_strided_slice %11 {offsets = [5, 0, 0], sizes = [1, 16, 32], strides = [1, 1, 1]} : vector<8x16x32xf32> to vector<1x16x32xf32>
    %107 = vector.shape_cast %106 : vector<1x16x32xf32> to vector<16x32xf32>
    %cst_26 = arith.constant dense<0.000000e+00> : vector<16x32xf32>
    %108 = tpu.matmul %95, %0, %cst_26 {dimension_numbers = #tpu.dot_dimension_numbers<[1], [0], [0], [1], [0, 0, 1, 1], [], []>} : vector<16x32xf32>, vector<32x32xf32>, vector<16x32xf32> -> vector<16x32xf32>
    %109 = arith.addf %107, %108 : vector<16x32xf32>
    %110 = math.tanh %109 : vector<16x32xf32>
    %111 = vector.shape_cast %105 : vector<16x1xi1> to vector<16x1xi1>
    %112 = vector.broadcast %111 : vector<16x1xi1> to vector<16x32xi1>
    %113 = arith.select %112, %110, %95 : vector<16x32xi1>, vector<16x32xf32>
    %114 = tpu.concatenate %113, %103 in 1 : vector<16x32xf32>, vector<16x32xf32> -> vector<16x64xf32>
    %cst_27 = arith.constant dense<0.000000e+00> : vector<16x32xf32>
    %115 = tpu.matmul %114, %1, %cst_27 {dimension_numbers = #tpu.dot_dimension_numbers<[1], [0], [0], [1], [0, 0, 1, 1], [], []>} : vector<16x64xf32>, vector<64x32xf32>, vector<16x32xf32> -> vector<16x32xf32>
    %116 = vector.broadcast %2 : vector<1x32xf32> to vector<16x32xf32>
    %117 = arith.addf %115, %116 : vector<16x32xf32>
    %118 = math.tanh %117 : vector<16x32xf32>
    %119 = vector.shape_cast %105 : vector<16x1xi1> to vector<16x1xi1>
    %120 = vector.broadcast %119 : vector<16x1xi1> to vector<16x32xi1>
    %121 = arith.select %120, %118, %103 : vector<16x32xi1>, vector<16x32xf32>
    %c6_i32 = arith.constant 6 : i32
    %122 = vector.broadcast %c6_i32 : i32 to vector<16x1xi32>
    %123 = arith.cmpi sgt, %3, %122 : vector<16x1xi32>
    %124 = vector.extract_strided_slice %11 {offsets = [6, 0, 0], sizes = [1, 16, 32], strides = [1, 1, 1]} : vector<8x16x32xf32> to vector<1x16x32xf32>
    %125 = vector.shape_cast %124 : vector<1x16x32xf32> to vector<16x32xf32>
    %cst_28 = arith.constant dense<0.000000e+00> : vector<16x32xf32>
    %126 = tpu.matmul %113, %0, %cst_28 {dimension_numbers = #tpu.dot_dimension_numbers<[1], [0], [0], [1], [0, 0, 1, 1], [], []>} : vector<16x32xf32>, vector<32x32xf32>, vector<16x32xf32> -> vector<16x32xf32>
    %127 = arith.addf %125, %126 : vector<16x32xf32>
    %128 = math.tanh %127 : vector<16x32xf32>
    %129 = vector.shape_cast %123 : vector<16x1xi1> to vector<16x1xi1>
    %130 = vector.broadcast %129 : vector<16x1xi1> to vector<16x32xi1>
    %131 = arith.select %130, %128, %113 : vector<16x32xi1>, vector<16x32xf32>
    %132 = tpu.concatenate %131, %121 in 1 : vector<16x32xf32>, vector<16x32xf32> -> vector<16x64xf32>
    %cst_29 = arith.constant dense<0.000000e+00> : vector<16x32xf32>
    %133 = tpu.matmul %132, %1, %cst_29 {dimension_numbers = #tpu.dot_dimension_numbers<[1], [0], [0], [1], [0, 0, 1, 1], [], []>} : vector<16x64xf32>, vector<64x32xf32>, vector<16x32xf32> -> vector<16x32xf32>
    %134 = vector.broadcast %2 : vector<1x32xf32> to vector<16x32xf32>
    %135 = arith.addf %133, %134 : vector<16x32xf32>
    %136 = math.tanh %135 : vector<16x32xf32>
    %137 = vector.shape_cast %123 : vector<16x1xi1> to vector<16x1xi1>
    %138 = vector.broadcast %137 : vector<16x1xi1> to vector<16x32xi1>
    %139 = arith.select %138, %136, %121 : vector<16x32xi1>, vector<16x32xf32>
    %c7_i32 = arith.constant 7 : i32
    %140 = vector.broadcast %c7_i32 : i32 to vector<16x1xi32>
    %141 = arith.cmpi sgt, %3, %140 : vector<16x1xi32>
    %142 = vector.extract_strided_slice %11 {offsets = [7, 0, 0], sizes = [1, 16, 32], strides = [1, 1, 1]} : vector<8x16x32xf32> to vector<1x16x32xf32>
    %143 = vector.shape_cast %142 : vector<1x16x32xf32> to vector<16x32xf32>
    %cst_30 = arith.constant dense<0.000000e+00> : vector<16x32xf32>
    %144 = tpu.matmul %131, %0, %cst_30 {dimension_numbers = #tpu.dot_dimension_numbers<[1], [0], [0], [1], [0, 0, 1, 1], [], []>} : vector<16x32xf32>, vector<32x32xf32>, vector<16x32xf32> -> vector<16x32xf32>
    %145 = arith.addf %143, %144 : vector<16x32xf32>
    %146 = math.tanh %145 : vector<16x32xf32>
    %147 = vector.shape_cast %141 : vector<16x1xi1> to vector<16x1xi1>
    %148 = vector.broadcast %147 : vector<16x1xi1> to vector<16x32xi1>
    %149 = arith.select %148, %146, %131 : vector<16x32xi1>, vector<16x32xf32>
    %150 = tpu.concatenate %149, %139 in 1 : vector<16x32xf32>, vector<16x32xf32> -> vector<16x64xf32>
    %cst_31 = arith.constant dense<0.000000e+00> : vector<16x32xf32>
    %151 = tpu.matmul %150, %1, %cst_31 {dimension_numbers = #tpu.dot_dimension_numbers<[1], [0], [0], [1], [0, 0, 1, 1], [], []>} : vector<16x64xf32>, vector<64x32xf32>, vector<16x32xf32> -> vector<16x32xf32>
    %152 = vector.broadcast %2 : vector<1x32xf32> to vector<16x32xf32>
    %153 = arith.addf %151, %152 : vector<16x32xf32>
    %154 = math.tanh %153 : vector<16x32xf32>
    %155 = vector.shape_cast %141 : vector<16x1xi1> to vector<16x1xi1>
    %156 = vector.broadcast %155 : vector<16x1xi1> to vector<16x32xi1>
    %157 = arith.select %156, %154, %139 : vector<16x32xi1>, vector<16x32xf32>
    %c0_32 = arith.constant 0 : index
    %c0_33 = arith.constant 0 : index
    %158 = vector.load %arg8[%c0_32, %c0_33] : memref<32x128xf32, #tpu.memory_space<vmem>>, vector<32x128xf32>
    %cst_34 = arith.constant dense<0.000000e+00> : vector<16x128xf32>
    %159 = tpu.matmul %157, %158, %cst_34 {dimension_numbers = #tpu.dot_dimension_numbers<[1], [0], [0], [1], [0, 0, 1, 1], [], []>} : vector<16x32xf32>, vector<32x128xf32>, vector<16x128xf32> -> vector<16x128xf32>
    %c0_35 = arith.constant 0 : index
    %c0_36 = arith.constant 0 : index
    %160 = vector.load %arg9[%c0_35, %c0_36] : memref<1x128xf32, #tpu.memory_space<vmem>>, vector<1x128xf32>
    %161 = vector.broadcast %160 : vector<1x128xf32> to vector<16x128xf32>
    %162 = arith.addf %159, %161 : vector<16x128xf32>
    %c0_37 = arith.constant 0 : index
    %c0_38 = arith.constant 0 : index
    %163 = vector.load %arg10[%c0_37, %c0_38] : memref<16x128xf32, #tpu.memory_space<vmem>>, vector<16x128xf32>
    tpu.vector_store %arg10[%c0_37, %c0_38], %162 {strides = array<i32>} : memref<16x128xf32, #tpu.memory_space<vmem>>, vector<16x128xf32>,
    return
  }
  func.func @transform_0(%arg0: i32) -> (i32, i32, i32) {
    %c0_i32 = arith.constant 0 : i32
    %c0_i32_0 = arith.constant 0 : i32
    %c0_i32_1 = arith.constant 0 : i32
    return %c0_i32, %arg0, %c0_i32_0 : i32, i32, i32
  }
  func.func @transform_1(%arg0: i32) -> (i32, i32) {
    %c0_i32 = arith.constant 0 : i32
    %c0_i32_0 = arith.constant 0 : i32
    return %arg0, %c0_i32 : i32, i32
  }
  func.func @transform_2(%arg0: i32) -> (i32, i32) {
    %c0_i32 = arith.constant 0 : i32
    %c0_i32_0 = arith.constant 0 : i32
    %c0_i32_1 = arith.constant 0 : i32
    return %c0_i32, %c0_i32_0 : i32, i32
  }
  func.func @transform_3(%arg0: i32) -> (i32, i32) {
    %c0_i32 = arith.constant 0 : i32
    %c0_i32_0 = arith.constant 0 : i32
    %c0_i32_1 = arith.constant 0 : i32
    return %c0_i32, %c0_i32_0 : i32, i32
  }
  func.func @transform_4(%arg0: i32) -> (i32, i32) {
    %c0_i32 = arith.constant 0 : i32
    %c0_i32_0 = arith.constant 0 : i32
    %c0_i32_1 = arith.constant 0 : i32
    return %c0_i32, %c0_i32_0 : i32, i32
  }
  func.func @transform_5(%arg0: i32) -> (i32, i32) {
    %c0_i32 = arith.constant 0 : i32
    %c0_i32_0 = arith.constant 0 : i32
    %c0_i32_1 = arith.constant 0 : i32
    return %c0_i32, %c0_i32_0 : i32, i32
  }
  func.func @transform_6(%arg0: i32) -> (i32, i32) {
    %c0_i32 = arith.constant 0 : i32
    %c0_i32_0 = arith.constant 0 : i32
    %c0_i32_1 = arith.constant 0 : i32
    return %c0_i32, %c0_i32_0 : i32, i32
  }
  func.func @transform_7(%arg0: i32) -> (i32, i32) {
    %c0_i32 = arith.constant 0 : i32
    %c0_i32_0 = arith.constant 0 : i32
    %c0_i32_1 = arith.constant 0 : i32
    return %c0_i32, %c0_i32_0 : i32, i32
  }
  func.func @transform_8(%arg0: i32) -> (i32, i32) {
    %c0_i32 = arith.constant 0 : i32
    %c0_i32_0 = arith.constant 0 : i32
    %c0_i32_1 = arith.constant 0 : i32
    return %c0_i32, %c0_i32_0 : i32, i32
  }
  func.func @transform_9(%arg0: i32) -> (i32, i32) {
    %c0_i32 = arith.constant 0 : i32
    %c0_i32_0 = arith.constant 0 : i32
    return %arg0, %c0_i32 : i32, i32
  }
}

</mosaic_0001>

<bundles_post_ra>
// kernel: tpu_custom_call.1
= control target key start
LH: loop header
LB: loop body
LE: loop exit
PB: predicated region body
PF: predicated region fallthrough
CT: control target
= control target key end

     0   :  { %14 = vsyncpa [#allocation3], 0  ;;  %s3299_s0 = inlined_call_operand.hbm [shape: f32[8,16,32], index: 0, kind: input, shape index: {}]   ;;  %s3300_s1 = inlined_call_operand.vmem [shape: s32[16,1], index: 1, kind: input, shape index: {}]   ;;  %s3301_s2 = inlined_call_operand.vmem [shape: f32[32,32], index: 2, kind: input, shape index: {}]   ;;  %s3302_s3 = inlined_call_operand.vmem [shape: f32[32,32], index: 3, kind: input, shape index: {}]   ;;  %s3303_s4 = inlined_call_operand.vmem [shape: f32[1,32], index: 4, kind: input, shape index: {}]   ;;  %s3304_s5 = inlined_call_operand.vmem [shape: f32[64,32], index: 5, kind: input, shape index: {}]   ;;  %s3305_s6 = inlined_call_operand.vmem [shape: f32[1,32], index: 6, kind: input, shape index: {}]   ;;  %s3306_s7 = inlined_call_operand.vmem [shape: f32[32,128], index: 7, kind: input, shape index: {}]   ;;  %s3307_s8 = inlined_call_operand.vmem [shape: f32[1,128], index: 8, kind: input, shape index: {}]   ;;  %s3308_s9 = inlined_call_operand.hbm [shape: f32[16,128], index: 9, kind: output, shape index: {}]  }
   0x1   :  { %15 = vsyncpa [#allocation4], 0  ;;  %s2791_s30 = smov [#allocation2]   ;;  %s2743_s13 = scalar_lea.hbm %s3299_s0, 2048 }
   0x2   :  { %s21_s10 = sshll.u32 %s2791_s30, 4  ;;  %p2744_p0 = scmp.ne.s32.totalorder %s3299_s0, %s2743_s13  ;;  %s22_s10 = int_to_ptr.vmem [resolvable:$true] %s21_s10 }
   0x3   :  { %p2747_p1 = scmp.lt.u32.totalorder %s2743_s13, %s3299_s0 }
   0x5   :  { %p2749_p2 = pnand %p2747_p1, %p2744_p0 }
   0x7   :  { %2752 = shalt.err (!%p2749_p2)
}
   0x8   :  { %s2753_s18 = scalar_lea.vmem %s22_s10, 2048  ;;  %p2758_p4 = scmp.lt.s32.totalorder %s22_s10, %s22_s10 }
   0x9   :  { %p2754_p3 = scmp.ne.s32.totalorder %s22_s10, %s2753_s18  ;;  %p2759_p5 = scmp.lt.s32.totalorder %s2753_s18, %s2753_s18 }
   0xb   :  { %p2760_p6 = por %p2759_p5, %p2758_p4 }
   0xd   :  { %p2761_p7 = pnand %p2760_p6, %p2754_p3 }
   0xf   :  { %2764 = shalt.err (!%p2761_p7)
}
  0x10   :  { %s2792_s19 = smov 128   ;;  %s2793_s20 = smov 8  }
  0x11   :  { %27 = dma.hbm_to_vmem [thread:$0]  %s3299_s0, 2048, %s22_s10, [#allocation3], %s2792_s19, %s2792_s19, %s2793_s20  }
  0x12   :  { %2787 = dma.done.wait [#allocation3], 2048  }
  0x13   :  { %2788 = vsyncadd [#allocation3], 4294965248  ;;  %v2794_v0 = vmov 0   ;;  %vm89_vm0 = vcmask 261120   ;;  %v78_v1 = vld [vmem:[%s3301_s2] sm:$0xff]  ;;  %v79_v2 = vld [vmem:[%s3301_s2 + $0x8] sm:$0xff] }
  0x14   :  { %2677 = vset.pattern.permute.xlu0 %v2794_v0  ;;  %2678 = vset.pattern.permute.xlu1 %v2794_v0  ;;  %v80_v3 = vld [vmem:[%s3301_s2 + $0x10] sm:$0xff]  ;;  %v2430_v4 = vpack.c.bf16 %v79_v2, %v78_v1  ;;  %v81_v5 = vld [vmem:[%s3301_s2 + $0x18] sm:$0xff]  ;;  %v62_v6 = vld [vmem:[#allocation2] sm:$0xff]  ;;  %v2795_v33 = vmov 0.0   ;;  %vm387_vm7 = vcmask 523264   ;;  %s2797_s24 = smov [#allocation5]  }
  0x15   :  { %v2434_v7 = vpack.c.bf16 %v81_v5, %v80_v3  ;;  %2155 = vmatprep.mubr.msk.f32.mxu0 %vm89_vm0, %v62_v6  ;;  %v47_v8 = vld [vmem:[%s3302_s3] sm:$0xff]  ;;  %v48_v9 = vld [vmem:[%s3302_s3 + $0x8] sm:$0xff]  ;;  %v49_v11 = vld [vmem:[%s3302_s3 + $0x10] sm:$0xff]  ;;  %s1930_s25 = sshll.u32 %s2797_s24, 4  ;;  %s1931_s25 = int_to_ptr.vmem [resolvable:$true] %s1930_s25 }
  0x16   :  { %2431 = vmatprep.subr.bf16.mxu0 %v2430_v4  ;;  %v2884_v10 = vpack.c.bf16 %v48_v9, %v47_v8  ;;  %v50_v12 = vld [vmem:[%s3302_s3 + $0x18] sm:$0xff]  ;;  %v63_v13 = vld [vmem:[#allocation2 + $0x8] sm:$0xff]  ;;  %v2895_v14 = vld [vmem:[%s3300_s1] sm:$0xff]  ;;  %s2765_s26 = scalar_lea.vmem %s1931_s25, 256  ;;  %p2770_p9 = scmp.lt.s32.totalorder %s1931_s25, %s1931_s25 }
  0x17   :  { %2433 = vmatpush3.bf16.msra.mxu0 %v2430_v4  ;;  %v2900_v15 = vld [vmem:[%s3300_s1 + $0x8] sm:$0xff]  ;;  %v64_v16 = vld [vmem:[#allocation2 + $0x10] sm:$0xff]  ;;  %v2903_v17 = vpack.c.bf16 %v50_v12, %v49_v11  ;;  %vm283_vm1 = vcmp.gt.s32.totalorder %v2895_v14, 0  ;;  %v65_v19 = vld [vmem:[#allocation2 + $0x18] sm:$0xff]  ;;  %vm473_vm3 = vcmp.gt.s32.totalorder %v2895_v14, 1  ;;  %vm667_vm11 = vcmp.gt.s32.totalorder %v2895_v14, 2  ;;  %p2766_p8 = scmp.ne.s32.totalorder %s1931_s25, %s2765_s26  ;;  %p2771_p10 = scmp.lt.s32.totalorder %s2765_s26, %s2765_s26 }
  0x18   :  { %2435 = vmatprep.subr.bf16.mxu0 %v2434_v7  ;;  %vm284_vm2 = vcmp.gt.s32.totalorder %v2900_v15, 0  ;;  %v367_v18 = vsel %vm283_vm1, 1, %v2794_v0  ;;  %v66_v21 = vld [vmem:[#allocation2 + $0x20] sm:$0xff]  ;;  %v67_v22 = vld [vmem:[#allocation2 + $0x28] sm:$0xff]  ;;  %v68_v23 = vld [vmem:[#allocation2 + $0x30] sm:$0xff]  ;;  %vm474_vm4 = vcmp.gt.s32.totalorder %v2900_v15, 1 }
  0x19   :  { %370 = vperm.xlu0 %2677, %v367_v18   ;;  %v368_v20 = vsel %vm284_vm2, 1, %v2794_v0  ;;  %v69_v24 = vld [vmem:[#allocation2 + $0x38] sm:$0xff]  ;;  %v70_v25 = vld [vmem:[#allocation2 + $0x40] sm:$0xff]  ;;  %v71_v26 = vld [vmem:[#allocation2 + $0x48] sm:$0xff]  ;;  %v560_v46 = vsel %vm473_vm3, 1, %v2794_v0  ;;  %v561_v47 = vsel %vm474_vm4, 1, %v2794_v0  ;;  %p2772_p11 = por %p2771_p10, %p2770_p9 }
  0x1a   :  { %v72_v27 = vld [vmem:[#allocation2 + $0x50] sm:$0xff]  ;;  %v73_v28 = vld [vmem:[#allocation2 + $0x58] sm:$0xff]  ;;  %v74_v29 = vld [vmem:[#allocation2 + $0x60] sm:$0xff]  ;;  %563 = vperm.xlu1 %2678, %v560_v46   ;;  %vm668_vm10 = vcmp.gt.s32.totalorder %v2900_v15, 2  ;;  %vm862_vm14 = vcmp.gt.s32.totalorder %v2900_v15, 3  ;;  %vm861_vm15 = vcmp.gt.s32.totalorder %v2895_v14, 3 }
  0x1b   :  { %2437 = vmatpush3.bf16.msra.mxu0 %v2434_v7  ;;  %v75_v30 = vld [vmem:[#allocation2 + $0x68] sm:$0xff]  ;;  %v76_v31 = vld [vmem:[#allocation2 + $0x70] sm:$0xff]  ;;  %v77_v32 = vld [vmem:[#allocation2 + $0x78] sm:$0xff]  ;;  %vm1056_vm3 = vcmp.gt.s32.totalorder %v2900_v15, 4  ;;  %vm1055_vm4 = vcmp.gt.s32.totalorder %v2895_v14, 4  ;;  %p2773_p12 = pnand %p2772_p11, %p2766_p8 }
  0x1c   :  { %2439 = vmatprep.subr.bf16.mxu0 %v2884_v10  ;;  %v51_v34 = vld [vmem:[%s3304_s5] sm:$0xff]  ;;  %v52_v35 = vld [vmem:[%s3304_s5 + $0x8] sm:$0xff]  ;;  %v53_v37 = vld [vmem:[%s3304_s5 + $0x10] sm:$0xff] }
  0x1d   :  { %373 = vperm.xlu0 %2677, %v368_v20   ;;  %v2938_v36 = vpack.c.bf16 %v52_v35, %v51_v34  ;;  %v54_v38 = vld [vmem:[%s3304_s5 + $0x18] sm:$0xff]  ;;  %v55_v40 = vld [vmem:[%s3304_s5 + $0x20] sm:$0xff]  ;;  %v56_v41 = vld [vmem:[%s3304_s5 + $0x28] sm:$0xff] }
  0x1e   :  { %2156 = vmatmul.mubr.msk.f32.vlgmr.msra.gmra.mrb[0].mxu0 %vm89_vm0, %v63_v13  ;;  %v2948_v39 = vpack.c.bf16 %v54_v38, %v53_v37  ;;  %v2958_v42 = vpack.c.bf16 %v56_v41, %v55_v40  ;;  %v57_v43 = vld [vmem:[%s3304_s5 + $0x30] sm:$0xff]  ;;  %v58_v44 = vld [vmem:[%s3304_s5 + $0x38] sm:$0xff]  ;;  %566 = vperm.xlu1 %2678, %v561_v47   ;;  %v2980_v48 = vld [vmem:[%s3303_s4] ss:$0 sm:$0xff] }
  0x1f   :  { %2441 = vmatpush3.bf16.msra.mxu0 %v2884_v10  ;;  %2158 = vmatprep.mubr.msk.f32.mxu0 %vm89_vm0, %v64_v16  ;;  %v2968_v45 = vpack.c.bf16 %v58_v44, %v57_v43  ;;  %v3007_v61 = vld [vmem:[%s3305_s6] ss:$0 sm:$0xff]  ;;  %s2796_s6 = smov 32  }
  0x20   :  { %2443 = vmatprep.subr.bf16.mxu0 %v2903_v17  ;;  %2447 = vmatprep.subr.bf16.mxu1 %v2938_v36 }
  0x21   :  { %2449 = vmatpush3.bf16.msra.mxu1 %v2938_v36 }
  0x22   :  { %2159 = vmatmul.mubr.msk.f32.gmra.mrb[2].mxu0 %vm89_vm0, %v65_v19  ;;  %2451 = vmatprep.subr.bf16.mxu1 %v2948_v39 }
  0x23   :  { %2161 = vmatprep.mubr.msk.f32.mxu0 %vm89_vm0, %v66_v21  ;;  %2445 = vmatpush3.bf16.msra.mxu0 %v2903_v17  ;;  %v755_v21 = vsel %vm668_vm10, 1, %v2794_v0  ;;  %vm1444_vm10 = vcmp.gt.s32.totalorder %v2900_v15, 6 }
  0x24   :  { %2463 = vmatprep.subr.bf16.mxu0 %v2884_v10 }
  0x25   :  { %2453 = vmatpush3.bf16.msra.mxu1 %v2948_v39 }
  0x26   :  { %2162 = vmatmul.mubr.msk.f32.gmra.mrb[4].mxu0 %vm89_vm0, %v67_v22  ;;  %2455 = vmatprep.subr.bf16.mxu1 %v2958_v42  ;;  %v754_v22 = vsel %vm667_vm11, 1, %v2794_v0  ;;  %vm1443_vm11 = vcmp.gt.s32.totalorder %v2895_v14, 6 }
  0x27   :  { %2164 = vmatprep.mubr.msk.f32.mxu0 %vm89_vm0, %v68_v23 }
  0x29   :  { %2457 = vmatpush3.bf16.msra.mxu1 %v2958_v42 }
  0x2a   :  { %2165 = vmatmul.mubr.msk.f32.gmra.mrb[6].mxu0 %vm89_vm0, %v69_v24  ;;  %2459 = vmatprep.subr.bf16.mxu1 %v2968_v45 }
  0x2b   :  { %2167 = vmatprep.mubr.msk.f32.mxu0 %vm89_vm0, %v70_v25 }
  0x2d   :  { %2461 = vmatpush3.bf16.msra.mxu1 %v2968_v45 }
  0x2e   :  { %2168 = vmatmul.mubr.msk.f32.gmra.mrb[8].mxu0 %vm89_vm0, %v71_v26  ;;  %2471 = vmatprep.subr.bf16.mxu1 %v2938_v36 }
  0x2f   :  { %2170 = vmatprep.mubr.msk.f32.mxu0 %vm89_vm0, %v72_v27 }
  0x32   :  { %2171 = vmatmul.mubr.msk.f32.gmra.mrb[10].mxu0 %vm89_vm0, %v73_v28 }
  0x33   :  { %2173 = vmatprep.mubr.msk.f32.mxu0 %vm89_vm0, %v74_v29 }
  0x36   :  { %2174 = vmatmul.mubr.msk.f32.gmra.mrb[12].mxu0 %vm89_vm0, %v75_v30 }
  0x37   :  { %2176 = vmatprep.mubr.msk.f32.mxu0 %vm89_vm0, %v76_v31 }
  0x3a   :  { %2177 = vmatmul.mubr.msk.f32.gmra.mrb[14].mxu0 %vm89_vm0, %v77_v32 }
  0x3b   :  { %2187 = vmatprep.mubr.f32.mxu0 %v2795_v33 }
  0x3e   :  { %2188 = vmatmul.mubr.f32.vlgmr.msra.gmra.mrb[0].mxu0 %v2795_v33 }
  0x3f   :  { %2465 = vmatpush3.bf16.msra.mxu0 %v2884_v10 }
  0x40   :  { %2467 = vmatprep.subr.bf16.mxu0 %v2903_v17 }
  0x43   :  { %2469 = vmatpush3.bf16.msra.mxu0 %v2903_v17 }
  0x44   :  { %2487 = vmatprep.subr.bf16.mxu0 %v2884_v10 }
  0x98   :  { %v371_v53 = vpop.permute.xlu0 %370 }
  0x99   :  { %vm375_vm6 = vcmp.eq.s32.totalorder %v371_v53, 1  ;;  %v3013_v7 = vpop.permute.xlu1 %563 }
  0x9a   :  { %vm568_vm8 = vcmp.eq.s32.totalorder %v3013_v7, 1 }
  0x9c   :  { %v374_v54 = vpop.permute.xlu0 %373 }
  0x9d   :  { %vm376_vm5 = vcmp.eq.s32.totalorder %v374_v54, 1  ;;  %v3015_v8 = vpop.permute.xlu1 %566 }
  0x9e   :  { %vm569_vm9 = vcmp.eq.s32.totalorder %v3015_v8, 1 }
 0x111   :  { %v2189_v49 = vpop.f32.mrb[0].mxu0 }
 0x112   :  { %v2638_v50 = vadd.f32 %v2189_v49, %v2980_v48  ;;  %v354_v51 = vpop.f32.mrb[1].mxu0 }
 0x113   :  { %v2639_v52 = vadd.f32 %v2980_v48, %v354_v51  ;;  %v948_v51 = vsel %vm861_vm15, 1, %v2794_v0  ;;  %vm1637_vm15 = vcmp.gt.s32.totalorder %v2895_v14, 7 }
 0x114   :  { %2679 = vtanh.f32 %v2638_v50  ;;  %v949_v50 = vsel %vm862_vm14, 1, %v2794_v0  ;;  %vm1638_vm14 = vcmp.gt.s32.totalorder %v2900_v15, 7 }
 0x115   :  { %2681 = vtanh.f32 %v2639_v52 }
 0x11e   :  { %v2680_v55 = vpop.eup %2679 }
 0x11f   :  { %v2682_v56 = vpop.eup %2681  ;;  %v378_v57 = vsel %vm376_vm5, %v2680_v55, 0.0 }
 0x120   :  { %v377_v58 = vsel %vm375_vm6, %v2682_v56, 0.0  ;;  %v380_v60 = vsel %vm89_vm0, %v378_v57, 0.0 }
 0x121   :  { %2217 = vmatprep.mubr.msk.f32.mxu0 %vm89_vm0, %v377_v58  ;;  %v379_v59 = vsel %vm89_vm0, %v377_v58, 0.0 }
 0x122   :  { %2206 = vmatprep.mubr.msk.f32.mxu1 %vm387_vm7, %v379_v59  ;;  %2218 = vmatmul.mubr.msk.f32.vlgmr.msra.gmra.mrb[2].mxu0 %vm89_vm0, %v378_v57 }
 0x123   :  { %2207 = vmatmul.mubr.msk.f32.vlgmr.msra.gmra.mrb[0].mxu1 %vm387_vm7, %v380_v60  ;;  %2489 = vmatpush3.bf16.msra.mxu0 %v2884_v10 }
 0x124   :  { %2491 = vmatprep.subr.bf16.mxu0 %v2903_v17  ;;  %2473 = vmatpush3.bf16.msra.mxu1 %v2938_v36 }
 0x125   :  { %2475 = vmatprep.subr.bf16.mxu1 %v2948_v39 }
 0x127   :  { %2493 = vmatpush3.bf16.msra.mxu0 %v2903_v17 }
 0x128   :  { %2477 = vmatpush3.bf16.msra.mxu1 %v2948_v39  ;;  %2511 = vmatprep.subr.bf16.mxu0 %v2884_v10 }
 0x129   :  { %2479 = vmatprep.subr.bf16.mxu1 %v2958_v42 }
 0x12c   :  { %2481 = vmatpush3.bf16.msra.mxu1 %v2958_v42 }
 0x12d   :  { %2483 = vmatprep.subr.bf16.mxu1 %v2968_v45 }
 0x130   :  { %2485 = vmatpush3.bf16.msra.mxu1 %v2968_v45 }
 0x131   :  { %2495 = vmatprep.subr.bf16.mxu1 %v2938_v36 }
 0x1f5   :  { %v2219_v62 = vpop.f32.mrb[2].mxu0 }
 0x1f6   :  { %v2640_v63 = vadd.f32 %v2219_v62, %v2980_v48  ;;  %v2208_v1 = vpop.f32.mrb[0].mxu1  ;;  %v547_v2 = vpop.f32.mrb[3].mxu0 }
 0x1f7   :  { %v466_v3 = vadd.f32 %v2208_v1, %v3007_v61  ;;  %v2641_v4 = vadd.f32 %v2980_v48, %v547_v2  ;;  %v460_v5 = vpop.f32.mrb[1].mxu1 }
 0x1f8   :  { %2683 = vtanh.f32 %v2640_v63  ;;  %v461_v6 = vadd.f32 %v3007_v61, %v460_v5 }
 0x1f9   :  { %2685 = vtanh.f32 %v466_v3 }
 0x1fa   :  { %2687 = vtanh.f32 %v2641_v4 }
 0x1fb   :  { %2689 = vtanh.f32 %v461_v6 }
 0x202   :  { %v2684_v9 = vpop.eup %2683 }
 0x203   :  { %v2686_v11 = vpop.eup %2685  ;;  %v571_v19 = vsel %vm569_vm9, %v2684_v9, %v378_v57 }
 0x204   :  { %v2688_v12 = vpop.eup %2687  ;;  %v3021_v13 = vsel %vm376_vm5, %v2686_v11, 0.0 }
 0x205   :  { %v2690_v16 = vpop.eup %2689  ;;  %v570_v18 = vsel %vm568_vm8, %v2688_v12, %v377_v58  ;;  %576 = vrot.lane.b32.xlu1 %v3021_v13, %s2796_s6 }
 0x206   :  { %2247 = vmatprep.mubr.msk.f32.mxu0 %vm89_vm0, %v570_v18  ;;  %v471_v20 = vsel %vm375_vm6, %v2690_v16, 0.0  ;;  %v1142_v16 = vsel %vm1055_vm4, 1, %v2794_v0 }
 0x207   :  { %2248 = vmatmul.mubr.msk.f32.vlgmr.msra.gmra.mrb[4].mxu0 %vm89_vm0, %v571_v19  ;;  %574 = vrot.lane.b32.xlu0 %v471_v20, %s2796_s6 }
 0x208   :  { %2513 = vmatpush3.bf16.msra.mxu0 %v2884_v10 }
 0x209   :  { %760 = vperm.xlu1 %2678, %v755_v21   ;;  %2515 = vmatprep.subr.bf16.mxu0 %v2903_v17 }
 0x20b   :  { %757 = vperm.xlu0 %2677, %v754_v22  }
 0x20c   :  { %2517 = vmatpush3.bf16.msra.mxu0 %v2903_v17 }
 0x20d   :  { %2535 = vmatprep.subr.bf16.mxu0 %v2884_v10 }
 0x277   :  { %v577_v23 = vpop.permute.xlu1 %576 }
 0x278   :  { %v581_v26 = vsel %vm89_vm0, %v571_v19, %v577_v23 }
 0x279   :  { %v575_v24 = vpop.permute.xlu0 %574 }
 0x27a   :  { %v580_v25 = vsel %vm89_vm0, %v570_v18, %v575_v24 }
 0x27b   :  { %2236 = vmatprep.mubr.msk.f32.mxu1 %vm387_vm7, %v580_v25 }
 0x27c   :  { %2237 = vmatmul.mubr.msk.f32.vlgmr.msra.gmra.mrb[2].mxu1 %vm387_vm7, %v581_v26 }
 0x27d   :  { %2497 = vmatpush3.bf16.msra.mxu1 %v2938_v36 }
 0x27e   :  { %2499 = vmatprep.subr.bf16.mxu1 %v2948_v39 }
 0x281   :  { %2501 = vmatpush3.bf16.msra.mxu1 %v2948_v39 }
 0x282   :  { %2503 = vmatprep.subr.bf16.mxu1 %v2958_v42 }
 0x285   :  { %2505 = vmatpush3.bf16.msra.mxu1 %v2958_v42 }
 0x286   :  { %2507 = vmatprep.subr.bf16.mxu1 %v2968_v45 }
 0x288   :  { %v3056_v32 = vpop.permute.xlu1 %760 }
 0x289   :  { %2509 = vmatpush3.bf16.msra.mxu1 %v2968_v45  ;;  %vm763_vm13 = vcmp.eq.s32.totalorder %v3056_v32, 1 }
 0x28a   :  { %2519 = vmatprep.subr.bf16.mxu1 %v2938_v36  ;;  %v3054_v31 = vpop.permute.xlu0 %757 }
 0x28b   :  { %vm762_vm12 = vcmp.eq.s32.totalorder %v3054_v31, 1 }
 0x2da   :  { %v2249_v27 = vpop.f32.mrb[4].mxu0 }
 0x2db   :  { %v2642_v28 = vadd.f32 %v2249_v27, %v2980_v48  ;;  %v741_v29 = vpop.f32.mrb[5].mxu0 }
 0x2dc   :  { %v2643_v30 = vadd.f32 %v2980_v48, %v741_v29 }
 0x2dd   :  { %2691 = vtanh.f32 %v2642_v28 }
 0x2de   :  { %2693 = vtanh.f32 %v2643_v30 }
 0x2e7   :  { %v2692_v33 = vpop.eup %2691 }
 0x2e8   :  { %v2694_v34 = vpop.eup %2693  ;;  %v765_v37 = vsel %vm763_vm13, %v2692_v33, %v571_v19 }
 0x2e9   :  { %v764_v35 = vsel %vm762_vm12, %v2694_v34, %v570_v18 }
 0x2ea   :  { %2277 = vmatprep.mubr.msk.f32.mxu0 %vm89_vm0, %v764_v35 }
 0x2eb   :  { %2278 = vmatmul.mubr.msk.f32.vlgmr.msra.gmra.mrb[6].mxu0 %vm89_vm0, %v765_v37 }
 0x2ec   :  { %2537 = vmatpush3.bf16.msra.mxu0 %v2884_v10 }
 0x2ed   :  { %2539 = vmatprep.subr.bf16.mxu0 %v2903_v17 }
 0x2f0   :  { %2541 = vmatpush3.bf16.msra.mxu0 %v2903_v17 }
 0x2f1   :  { %2559 = vmatprep.subr.bf16.mxu0 %v2884_v10 }
 0x34f   :  { %v2238_v38 = vpop.f32.mrb[2].mxu1 }
 0x350   :  { %v660_v40 = vadd.f32 %v2238_v38, %v3007_v61  ;;  %v654_v41 = vpop.f32.mrb[3].mxu1 }
 0x351   :  { %v655_v43 = vadd.f32 %v3007_v61, %v654_v41 }
 0x352   :  { %2695 = vtanh.f32 %v660_v40 }
 0x353   :  { %2697 = vtanh.f32 %v655_v43 }
 0x35c   :  { %v2696_v44 = vpop.eup %2695 }
 0x35d   :  { %v2698_v46 = vpop.eup %2697  ;;  %v666_v47 = vsel %vm569_vm9, %v2696_v44, %v3021_v13  ;;  %v1143_v13 = vsel %vm1056_vm3, 1, %v2794_v0  ;;  %vm1249_vm9 = vcmp.gt.s32.totalorder %v2895_v14, 5 }
 0x35e   :  { %770 = vrot.lane.b32.xlu1 %v666_v47, %s2796_s6  ;;  %v665_v49 = vsel %vm568_vm8, %v2698_v46, %v471_v20  ;;  %vm1250_vm8 = vcmp.gt.s32.totalorder %v2900_v15, 5  ;;  %v1336_v44 = vsel %vm1249_vm9, 1, %v2794_v0 }
 0x35f   :  { %768 = vrot.lane.b32.xlu0 %v665_v49, %s2796_s6  ;;  %v1337_v43 = vsel %vm1250_vm8, 1, %v2794_v0 }
 0x362   :  { %954 = vperm.xlu1 %2678, %v949_v50  }
 0x363   :  { %951 = vperm.xlu0 %2677, %v948_v51  }
 0x3be   :  { %v2279_v52 = vpop.f32.mrb[6].mxu0 }
 0x3bf   :  { %v935_v53 = vpop.f32.mrb[7].mxu0  ;;  %v2644_v59 = vadd.f32 %v2279_v52, %v2980_v48 }
 0x3c0   :  { %v2645_v58 = vadd.f32 %v2980_v48, %v935_v53 }
 0x3c2   :  { %2699 = vtanh.f32 %v2645_v58 }
 0x3c3   :  { %2701 = vtanh.f32 %v2644_v59 }
 0x3cc   :  { %v2700_v63 = vpop.eup %2699 }
 0x3cd   :  { %v2702_v1 = vpop.eup %2701 }
 0x3d0   :  { %v771_v54 = vpop.permute.xlu1 %770 }
 0x3d1   :  { %v769_v55 = vpop.permute.xlu0 %768  ;;  %v775_v57 = vsel %vm89_vm0, %v765_v37, %v771_v54 }
 0x3d2   :  { %v774_v56 = vsel %vm89_vm0, %v764_v35, %v769_v55 }
 0x3d3   :  { %2266 = vmatprep.mubr.msk.f32.mxu1 %vm387_vm7, %v774_v56 }
 0x3d4   :  { %2267 = vmatmul.mubr.msk.f32.vlgmr.msra.gmra.mrb[4].mxu1 %vm387_vm7, %v775_v57 }
 0x3d5   :  { %2521 = vmatpush3.bf16.msra.mxu1 %v2938_v36 }
 0x3d6   :  { %2523 = vmatprep.subr.bf16.mxu1 %v2948_v39 }
 0x3d9   :  { %2525 = vmatpush3.bf16.msra.mxu1 %v2948_v39 }
 0x3da   :  { %2527 = vmatprep.subr.bf16.mxu1 %v2958_v42 }
 0x3dd   :  { %2529 = vmatpush3.bf16.msra.mxu1 %v2958_v42 }
 0x3de   :  { %2531 = vmatprep.subr.bf16.mxu1 %v2968_v45 }
 0x3e1   :  { %v3095_v60 = vpop.permute.xlu1 %954  ;;  %2533 = vmatpush3.bf16.msra.mxu1 %v2968_v45 }
 0x3e2   :  { %vm957_vm1 = vcmp.eq.s32.totalorder %v3095_v60, 1  ;;  %v3099_v62 = vpop.permute.xlu0 %951  ;;  %2543 = vmatprep.subr.bf16.mxu1 %v2938_v36 }
 0x3e3   :  { %vm956_vm2 = vcmp.eq.s32.totalorder %v3099_v62, 1  ;;  %v959_v3 = vsel %vm957_vm1, %v2702_v1, %v765_v37  ;;  %v1531_v62 = vsel %vm1444_vm10, 1, %v2794_v0 }
 0x3e4   :  { %v958_v2 = vsel %vm956_vm2, %v2700_v63, %v764_v35  ;;  %v1530_v63 = vsel %vm1443_vm11, 1, %v2794_v0 }
 0x3e5   :  { %2307 = vmatprep.mubr.msk.f32.mxu0 %vm89_vm0, %v958_v2 }
 0x3e6   :  { %2308 = vmatmul.mubr.msk.f32.vlgmr.msra.gmra.mrb[8].mxu0 %vm89_vm0, %v959_v3 }
 0x3e7   :  { %2561 = vmatpush3.bf16.msra.mxu0 %v2884_v10 }
 0x3e8   :  { %2563 = vmatprep.subr.bf16.mxu0 %v2903_v17 }
 0x3eb   :  { %2565 = vmatpush3.bf16.msra.mxu0 %v2903_v17 }
 0x3ec   :  { %2567 = vmatprep.subr.bf16.mxu0 %v2938_v36 }
 0x4a7   :  { %v2268_v4 = vpop.f32.mrb[4].mxu1 }
 0x4a8   :  { %v854_v5 = vadd.f32 %v2268_v4, %v3007_v61  ;;  %v848_v6 = vpop.f32.mrb[5].mxu1 }
 0x4a9   :  { %v849_v7 = vadd.f32 %v3007_v61, %v848_v6 }
 0x4aa   :  { %2703 = vtanh.f32 %v854_v5 }
 0x4ab   :  { %2705 = vtanh.f32 %v849_v7 }
 0x4b4   :  { %v2704_v8 = vpop.eup %2703 }
 0x4b5   :  { %v2706_v9 = vpop.eup %2705  ;;  %v860_v11 = vsel %vm763_vm13, %v2704_v8, %v666_v47 }
 0x4b6   :  { %964 = vrot.lane.b32.xlu1 %v860_v11, %s2796_s6  ;;  %v859_v12 = vsel %vm762_vm12, %v2706_v9, %v665_v49 }
 0x4b7   :  { %962 = vrot.lane.b32.xlu0 %v859_v12, %s2796_s6 }
 0x4b9   :  { %v2309_v18 = vpop.f32.mrb[8].mxu0 }
 0x4ba   :  { %1148 = vperm.xlu1 %2678, %v1143_v13   ;;  %v1129_v19 = vpop.f32.mrb[9].mxu0  ;;  %v2646_v25 = vadd.f32 %v2309_v18, %v2980_v48 }
 0x4bb   :  { %1145 = vperm.xlu0 %2677, %v1142_v16   ;;  %v2647_v24 = vadd.f32 %v2980_v48, %v1129_v19 }
 0x4bd   :  { %2707 = vtanh.f32 %v2647_v24 }
 0x4be   :  { %2709 = vtanh.f32 %v2646_v25 }
 0x4c7   :  { %v2708_v28 = vpop.eup %2707 }
 0x4c8   :  { %v2710_v29 = vpop.eup %2709 }
 0x528   :  { %v965_v20 = vpop.permute.xlu1 %964 }
 0x529   :  { %v963_v21 = vpop.permute.xlu0 %962  ;;  %v969_v23 = vsel %vm89_vm0, %v959_v3, %v965_v20 }
 0x52a   :  { %v968_v22 = vsel %vm89_vm0, %v958_v2, %v963_v21 }
 0x52b   :  { %2296 = vmatprep.mubr.msk.f32.mxu1 %vm387_vm7, %v968_v22 }
 0x52c   :  { %2297 = vmatmul.mubr.msk.f32.vlgmr.msra.gmra.mrb[6].mxu1 %vm387_vm7, %v969_v23 }
 0x52d   :  { %2545 = vmatpush3.bf16.msra.mxu1 %v2938_v36 }
 0x52e   :  { %2547 = vmatprep.subr.bf16.mxu1 %v2948_v39 }
 0x531   :  { %2549 = vmatpush3.bf16.msra.mxu1 %v2948_v39 }
 0x532   :  { %2551 = vmatprep.subr.bf16.mxu1 %v2958_v42 }
 0x535   :  { %2553 = vmatpush3.bf16.msra.mxu1 %v2958_v42 }
 0x536   :  { %2555 = vmatprep.subr.bf16.mxu1 %v2968_v45 }
 0x539   :  { %v3137_v26 = vpop.permute.xlu1 %1148  ;;  %2557 = vmatpush3.bf16.msra.mxu1 %v2968_v45 }
 0x53a   :  { %vm1151_vm5 = vcmp.eq.s32.totalorder %v3137_v26, 1  ;;  %v3141_v27 = vpop.permute.xlu0 %1145  ;;  %2591 = vmatprep.subr.bf16.mxu1 %v2938_v36 }
 0x53b   :  { %vm1150_vm6 = vcmp.eq.s32.totalorder %v3141_v27, 1  ;;  %v3151_v31 = vsel %vm1151_vm5, %v2710_v29, %v959_v3  ;;  %v1725_v27 = vsel %vm1638_vm14, 1, %v2794_v0 }
 0x53c   :  { %v3147_v30 = vsel %vm1150_vm6, %v2708_v28, %v958_v2  ;;  %v1724_v28 = vsel %vm1637_vm15, 1, %v2794_v0 }
 0x53d   :  { %2337 = vmatprep.mubr.msk.f32.mxu0 %vm89_vm0, %v3147_v30 }
 0x53e   :  { %2338 = vmatmul.mubr.msk.f32.vlgmr.msra.gmra.mrb[10].mxu0 %vm89_vm0, %v3151_v31 }
 0x53f   :  { %2569 = vmatpush3.bf16.msra.mxu0 %v2938_v36 }
 0x540   :  { %2571 = vmatprep.subr.bf16.mxu0 %v2948_v39 }
 0x543   :  { %2573 = vmatpush3.bf16.msra.mxu0 %v2948_v39 }
 0x544   :  { %2575 = vmatprep.subr.bf16.mxu0 %v2958_v42 }
 0x547   :  { %2577 = vmatpush3.bf16.msra.mxu0 %v2958_v42 }
 0x548   :  { %2579 = vmatprep.subr.bf16.mxu0 %v2968_v45 }
 0x54b   :  { %2581 = vmatpush3.bf16.msra.mxu0 %v2968_v45 }
 0x54c   :  { %2583 = vmatprep.subr.bf16.mxu0 %v2884_v10 }
 0x5ff   :  { %v2298_v32 = vpop.f32.mrb[6].mxu1 }
 0x600   :  { %v1048_v33 = vadd.f32 %v2298_v32, %v3007_v61  ;;  %v1042_v34 = vpop.f32.mrb[7].mxu1 }
 0x601   :  { %v1043_v35 = vadd.f32 %v3007_v61, %v1042_v34 }
 0x602   :  { %2711 = vtanh.f32 %v1048_v33 }
 0x603   :  { %2713 = vtanh.f32 %v1043_v35 }
 0x60c   :  { %v2712_v37 = vpop.eup %2711 }
 0x60d   :  { %v2714_v38 = vpop.eup %2713  ;;  %v1054_v40 = vsel %vm957_vm1, %v2712_v37, %v860_v11 }
 0x60e   :  { %1158 = vrot.lane.b32.xlu1 %v1054_v40, %s2796_s6  ;;  %v1053_v41 = vsel %vm956_vm2, %v2714_v38, %v859_v12 }
 0x60f   :  { %1156 = vrot.lane.b32.xlu0 %v1053_v41, %s2796_s6 }
 0x611   :  { %v2339_v46 = vpop.f32.mrb[10].mxu0 }
 0x612   :  { %1342 = vperm.xlu1 %2678, %v1337_v43   ;;  %v1323_v47 = vpop.f32.mrb[11].mxu0  ;;  %v2648_v2 = vadd.f32 %v2339_v46, %v2980_v48 }
 0x613   :  { %1339 = vperm.xlu0 %2677, %v1336_v44   ;;  %v2649_v1 = vadd.f32 %v2980_v48, %v1323_v47 }
 0x680   :  { %v1159_v49 = vpop.permute.xlu1 %1158 }
 0x681   :  { %v1157_v50 = vpop.permute.xlu0 %1156  ;;  %v1163_v52 = vsel %vm89_vm0, %v3151_v31, %v1159_v49 }
 0x682   :  { %v1162_v51 = vsel %vm89_vm0, %v3147_v30, %v1157_v50 }
 0x683   :  { %2326 = vmatprep.mubr.msk.f32.mxu1 %vm387_vm7, %v1162_v51 }
 0x684   :  { %2327 = vmatmul.mubr.msk.f32.vlgmr.msra.gmra.mrb[8].mxu1 %vm387_vm7, %v1163_v52 }
 0x685   :  { %2593 = vmatpush3.bf16.msra.mxu1 %v2938_v36 }
 0x686   :  { %2595 = vmatprep.subr.bf16.mxu1 %v2948_v39 }
 0x689   :  { %2597 = vmatpush3.bf16.msra.mxu1 %v2948_v39 }
 0x68a   :  { %2599 = vmatprep.subr.bf16.mxu1 %v2958_v42 }
 0x68d   :  { %2601 = vmatpush3.bf16.msra.mxu1 %v2958_v42 }
 0x68e   :  { %2603 = vmatprep.subr.bf16.mxu1 %v2968_v45 }
 0x691   :  { %2605 = vmatpush3.bf16.msra.mxu1 %v2968_v45  ;;  %v1343_v4 = vpop.permute.xlu1 %1342 }
 0x692   :  { %2615 = vmatprep.subr.bf16.mxu1 %v2938_v36  ;;  %v1340_v3 = vpop.permute.xlu0 %1339  ;;  %vm1345_vm13 = vcmp.eq.s32.totalorder %v1343_v4, 1 }
 0x693   :  { %vm1344_vm12 = vcmp.eq.s32.totalorder %v1340_v3, 1 }
 0x757   :  { %v2328_v53 = vpop.f32.mrb[8].mxu1 }
 0x758   :  { %v1242_v54 = vadd.f32 %v2328_v53, %v3007_v61  ;;  %v1236_v55 = vpop.f32.mrb[9].mxu1 }
 0x759   :  { %v1237_v56 = vadd.f32 %v3007_v61, %v1236_v55 }
 0x75a   :  { %2715 = vtanh.f32 %v1242_v54 }
 0x75b   :  { %2717 = vtanh.f32 %v1237_v56 }
 0x75c   :  { %2719 = vtanh.f32 %v2649_v1 }
 0x75d   :  { %2721 = vtanh.f32 %v2648_v2 }
 0x764   :  { %v2716_v57 = vpop.eup %2715 }
 0x765   :  { %v2718_v58 = vpop.eup %2717  ;;  %v1248_v59 = vsel %vm1151_vm5, %v2716_v57, %v1054_v40 }
 0x766   :  { %1352 = vrot.lane.b32.xlu1 %v1248_v59, %s2796_s6  ;;  %v1247_v60 = vsel %vm1150_vm6, %v2718_v58, %v1053_v41  ;;  %v2720_v5 = vpop.eup %2719 }
 0x767   :  { %1350 = vrot.lane.b32.xlu0 %v1247_v60, %s2796_s6  ;;  %v2722_v7 = vpop.eup %2721  ;;  %v1346_v8 = vsel %vm1344_vm12, %v2720_v5, %v3147_v30 }
 0x768   :  { %v1347_v11 = vsel %vm1345_vm13, %v2722_v7, %v3151_v31 }
 0x76a   :  { %1536 = vperm.xlu1 %2678, %v1531_v62  }
 0x76b   :  { %1533 = vperm.xlu0 %2677, %v1530_v63   ;;  %v1834_v63 = vld [vmem:[%s3306_s7 + $0x18] sm:$0xff] }
 0x7d8   :  { %v1353_v6 = vpop.permute.xlu1 %1352 }
 0x7d9   :  { %v1351_v9 = vpop.permute.xlu0 %1350  ;;  %v1357_v13 = vsel %vm89_vm0, %v1347_v11, %v1353_v6 }
 0x7da   :  { %v1356_v12 = vsel %vm89_vm0, %v1346_v8, %v1351_v9 }
 0x7db   :  { %2356 = vmatprep.mubr.msk.f32.mxu0 %vm387_vm7, %v1356_v12 }
 0x7dc   :  { %2357 = vmatmul.mubr.msk.f32.vlgmr.msra.gmra.mrb[16].mxu0 %vm387_vm7, %v1357_v13 }
 0x7dd   :  { %2585 = vmatpush3.bf16.msra.mxu0 %v2884_v10  ;;  %2367 = vmatprep.mubr.msk.f32.mxu0 %vm89_vm0, %v1346_v8 }
 0x7de   :  { %2587 = vmatprep.subr.bf16.mxu0 %v2903_v17 }
 0x7e1   :  { %2589 = vmatpush3.bf16.msra.mxu0 %v2903_v17 }
 0x7e2   :  { %2607 = vmatprep.subr.bf16.mxu0 %v2884_v10 }
 0x7e4   :  { %2368 = vmatmul.mubr.msk.f32.vlgmr.msra.gmra.mrb[12].mxu0 %vm89_vm0, %v1347_v11 }
 0x7e5   :  { %2609 = vmatpush3.bf16.msra.mxu0 %v2884_v10 }
 0x7e6   :  { %2611 = vmatprep.subr.bf16.mxu0 %v2903_v17 }
 0x7e9   :  { %2613 = vmatpush3.bf16.msra.mxu0 %v2903_v17  ;;  %v1537_v30 = vpop.permute.xlu1 %1536 }
 0x7ea   :  { %v1534_v29 = vpop.permute.xlu0 %1533  ;;  %vm1539_vm2 = vcmp.eq.s32.totalorder %v1537_v30, 1 }
 0x7eb   :  { %vm1538_vm1 = vcmp.eq.s32.totalorder %v1534_v29, 1 }
 0x8af   :  { %v2358_v16 = vpop.f32.mrb[16].mxu0 }
 0x8b0   :  { %v1436_v18 = vadd.f32 %v2358_v16, %v3007_v61  ;;  %v1430_v19 = vpop.f32.mrb[17].mxu0 }
 0x8b1   :  { %v1431_v20 = vadd.f32 %v3007_v61, %v1430_v19 }
 0x8b2   :  { %2723 = vtanh.f32 %v1436_v18 }
 0x8b3   :  { %2725 = vtanh.f32 %v1431_v20 }
 0x8b7   :  { %v2369_v21 = vpop.f32.mrb[12].mxu0 }
 0x8b8   :  { %v2650_v22 = vadd.f32 %v2369_v21, %v2980_v48  ;;  %v1517_v23 = vpop.f32.mrb[13].mxu0 }
 0x8b9   :  { %v2651_v24 = vadd.f32 %v2980_v48, %v1517_v23 }
 0x8ba   :  { %2727 = vtanh.f32 %v2650_v22 }
 0x8bb   :  { %2729 = vtanh.f32 %v2651_v24 }
 0x8bc   :  { %v2724_v10 = vpop.eup %2723 }
 0x8bd   :  { %v2726_v17 = vpop.eup %2725  ;;  %v1442_v25 = vsel %vm1345_vm13, %v2724_v10, %v1248_v59  ;;  %v1832_v59 = vld [vmem:[%s3306_s7 + $0x8] sm:$0xff] }
 0x8be   :  { %1546 = vrot.lane.b32.xlu1 %v1442_v25, %s2796_s6  ;;  %v1441_v26 = vsel %vm1344_vm12, %v2726_v17, %v1247_v60  ;;  %v1833_v60 = vld [vmem:[%s3306_s7 + $0x10] sm:$0xff] }
 0x8bf   :  { %1544 = vrot.lane.b32.xlu0 %v1441_v26, %s2796_s6  ;;  %v2634_v1 = vpack.c.bf16 %v1834_v63, %v1833_v60 }
 0x8c2   :  { %1730 = vperm.xlu1 %2678, %v1725_v27  }
 0x8c3   :  { %1727 = vperm.xlu0 %2677, %v1724_v28  }
 0x8c4   :  { %v2728_v15 = vpop.eup %2727 }
 0x8c5   :  { %v2730_v31 = vpop.eup %2729  ;;  %v1541_v32 = vsel %vm1539_vm2, %v2728_v15, %v1347_v11  ;;  %v1990_v11 = vld [vmem:[%s3307_s8] ss:$0 sm:$0xff] }
 0x8c6   :  { %v1540_v14 = vsel %vm1538_vm1, %v2730_v31, %v1346_v8 }
 0x8c7   :  { %2397 = vmatprep.mubr.msk.f32.mxu0 %vm89_vm0, %v1540_v14 }
 0x8c8   :  { %2398 = vmatmul.mubr.msk.f32.vlgmr.msra.gmra.mrb[14].mxu0 %vm89_vm0, %v1541_v32 }
 0x930   :  { %v1547_v33 = vpop.permute.xlu1 %1546 }
 0x931   :  { %v1545_v34 = vpop.permute.xlu0 %1544  ;;  %v1551_v35 = vsel %vm89_vm0, %v1541_v32, %v1547_v33 }
 0x932   :  { %v1550_v0 = vsel %vm89_vm0, %v1540_v14, %v1545_v34 }
 0x933   :  { %2386 = vmatprep.mubr.msk.f32.mxu1 %vm387_vm7, %v1550_v0 }
 0x934   :  { %2387 = vmatmul.mubr.msk.f32.vlgmr.msra.gmra.mrb[10].mxu1 %vm387_vm7, %v1551_v35 }
 0x935   :  { %2617 = vmatpush3.bf16.msra.mxu1 %v2938_v36 }
 0x936   :  { %2619 = vmatprep.subr.bf16.mxu1 %v2948_v39 }
 0x939   :  { %2621 = vmatpush3.bf16.msra.mxu1 %v2948_v39 }
 0x93a   :  { %2623 = vmatprep.subr.bf16.mxu1 %v2958_v42 }
 0x93d   :  { %2625 = vmatpush3.bf16.msra.mxu1 %v2958_v42 }
 0x93e   :  { %2627 = vmatprep.subr.bf16.mxu1 %v2968_v45 }
 0x941   :  { %2629 = vmatpush3.bf16.msra.mxu1 %v2968_v45  ;;  %v1731_v49 = vpop.permute.xlu1 %1730 }
 0x942   :  { %v1728_v50 = vpop.permute.xlu0 %1727  ;;  %vm1733_vm4 = vcmp.eq.s32.totalorder %v1731_v49, 1 }
 0x943   :  { %vm1732_vm3 = vcmp.eq.s32.totalorder %v1728_v50, 1 }
 0x99b   :  { %v2399_v37 = vpop.f32.mrb[14].mxu0 }
 0x99c   :  { %v1711_v38 = vpop.f32.mrb[15].mxu0  ;;  %v2652_v47 = vadd.f32 %v2399_v37, %v2980_v48 }
 0x99d   :  { %v2653_v45 = vadd.f32 %v2980_v48, %v1711_v38  ;;  %v1831_v48 = vld [vmem:[%s3306_s7] sm:$0xff] }
 0x99e   :  { %v2630_v62 = vpack.c.bf16 %v1832_v59, %v1831_v48 }
 0x9a0   :  { %2631 = vmatprep.subr.bf16.mxu0 %v2630_v62 }
 0x9a1   :  { %2633 = vmatpush3.bf16.msra.mxu0 %v2630_v62 }
 0x9a2   :  { %2635 = vmatprep.subr.bf16.mxu0 %v2634_v1 }
 0x9a5   :  { %2637 = vmatpush3.bf16.msra.mxu0 %v2634_v1 }
 0xa07   :  { %v2388_v40 = vpop.f32.mrb[10].mxu1 }
 0xa08   :  { %v1630_v41 = vadd.f32 %v2388_v40, %v3007_v61  ;;  %v1624_v43 = vpop.f32.mrb[11].mxu1 }
 0xa09   :  { %v1625_v36 = vadd.f32 %v3007_v61, %v1624_v43 }
 0xa0a   :  { %2731 = vtanh.f32 %v1630_v41 }
 0xa0b   :  { %2733 = vtanh.f32 %v1625_v36 }
 0xa0c   :  { %2735 = vtanh.f32 %v2653_v45 }
 0xa0d   :  { %2737 = vtanh.f32 %v2652_v47 }
 0xa14   :  { %v2732_v44 = vpop.eup %2731 }
 0xa15   :  { %v2734_v39 = vpop.eup %2733  ;;  %v1636_v46 = vsel %vm1539_vm2, %v2732_v44, %v1442_v25 }
 0xa16   :  { %1740 = vrot.lane.b32.xlu1 %v1636_v46, %s2796_s6  ;;  %v1635_v42 = vsel %vm1538_vm1, %v2734_v39, %v1441_v26  ;;  %v2736_v51 = vpop.eup %2735 }
 0xa17   :  { %1738 = vrot.lane.b32.xlu0 %v1635_v42, %s2796_s6  ;;  %v2738_v52 = vpop.eup %2737  ;;  %v1734_v54 = vsel %vm1732_vm3, %v2736_v51, %v1540_v14 }
 0xa18   :  { %v1735_v56 = vsel %vm1733_vm4, %v2738_v52, %v1541_v32 }
 0xa88   :  { %v1741_v53 = vpop.permute.xlu1 %1740 }
 0xa89   :  { %v1739_v55 = vpop.permute.xlu0 %1738  ;;  %v1745_v58 = vsel %vm89_vm0, %v1735_v56, %v1741_v53 }
 0xa8a   :  { %v1744_v57 = vsel %vm89_vm0, %v1734_v54, %v1739_v55 }
 0xa8b   :  { %2416 = vmatprep.mubr.msk.f32.mxu1 %vm387_vm7, %v1744_v57 }
 0xa8c   :  { %2417 = vmatmul.mubr.msk.f32.vlgmr.msra.gmra.mrb[12].mxu1 %vm387_vm7, %v1745_v58 }
 0xb5f   :  { %v2418_v2 = vpop.f32.mrb[12].mxu1 }
 0xb60   :  { %v1824_v3 = vadd.f32 %v2418_v2, %v3007_v61  ;;  %v1818_v4 = vpop.f32.mrb[13].mxu1 }
 0xb61   :  { %v1819_v5 = vadd.f32 %v3007_v61, %v1818_v4 }
 0xb62   :  { %2739 = vtanh.f32 %v1824_v3 }
 0xb63   :  { %2741 = vtanh.f32 %v1819_v5 }
 0xb6c   :  { %v2740_v6 = vpop.eup %2739 }
 0xb6d   :  { %v2742_v7 = vpop.eup %2741  ;;  %v1830_v9 = vsel %vm1733_vm4, %v2740_v6, %v1636_v46 }
 0xb6e   :  { %v1829_v8 = vsel %vm1732_vm3, %v2742_v7, %v1635_v42 }
 0xb6f   :  { %2427 = vmatprep.mubr.msk.f32.mxu0 %vm89_vm0, %v1829_v8 }
 0xb70   :  { %2428 = vmatmul.mubr.msk.f32.vlgmr.msra.gmra.mrb[18].mxu0 %vm89_vm0, %v1830_v9 }
 0xc43   :  { %v2429_v12 = vpop.f32.mrb[18].mxu0 }
 0xc44   :  { %v1920_v61 = vadd.f32 %v2429_v12, %v1990_v11  ;;  %v1914_v13 = vpop.f32.mrb[19].mxu0 }
 0xc45   :  { %v1915_v16 = vadd.f32 %v1990_v11, %v1914_v13 }
 0xc46   :  { %1924 = vst [vmem:[#allocation5 + $0x8] sm:$0xff] %v1920_v61 }
 0xc47   :  { %1923 = vst [vmem:[#allocation5] sm:$0xff] %v1915_v16 }
 0xc48   :  { %2776 = shalt.err (!%p2773_p12)
}
 0xc49   :  { %s2777_s8 = scalar_lea.hbm %s3308_s9, 256 }
 0xc4a   :  { %p2778_p13 = scmp.ne.s32.totalorder %s3308_s9, %s2777_s8  ;;  %p2781_p0 = scmp.lt.u32.totalorder %s2777_s8, %s3308_s9 }
 0xc4c   :  { %p2783_p1 = pnand %p2781_p0, %p2778_p13 }
 0xc4e   :  { %2786 = shalt.err (!%p2783_p1)
}
 0xc4f   :  { %1936 = dma.vmem_to_hbm [thread:$0]  %s1931_s25, 256, %s3308_s9, [#allocation4], %s2792_s19, %s2792_s19, %s2793_s20  }
 0xc50   :  { %2789 = dma.done.wait [#allocation4], 256  }
 0xc51   :  { %2790 = vsyncadd [#allocation4], 4294967040 }
 0xc52   :  { %1940 = vsyncpa [#allocation3], 1 }
 0xc53   :  { %1941 = vsyncpa [#allocation4], 1 }

</bundles_post_ra>
